<compile_context>
chip_gen: v7x
topology: tpu7x:2x2x1
jax: 0.10.0
libtpu: 0.0.40
codegen_flags: <defaults>
</compile_context>

<pallas_src>
import functools
import math

import jax
import jax.numpy as jnp
from jax.experimental import pallas as pl
from jax.experimental.pallas import tpu as pltpu

_LANE = 128


def _round_up(x, m):
    return ((x + m - 1) // m) * m


def _vmem_capacity_bytes():
    """Per-core VMEM capacity; conservative fallback = v7x (64 MiB per TC)."""
    try:
        info = pltpu.get_tpu_info()
        cap = getattr(info, "vmem_capacity_bytes", None)
        if cap:
            return int(cap)
    except Exception:
        pass
    return 64 * 1024 * 1024


def _budgets():
    """(vmem_limit_bytes, per-tile f32 byte budget), generation aware."""
    cap = _vmem_capacity_bytes()
    # ~75% of physical VMEM, capped at 96 MiB (v5e/v6e) -> 48 MiB on v7x.
    vmem_limit = min((cap * 3) // 4, 96 * 1024 * 1024)
    # 6-8 MiB per (TB, D) f32 tile: double-buffered in+out + temporaries stay
    # comfortably under the scoped limit while amortizing the ~0.35us/step cost.
    tile_budget = min(8 * 1024 * 1024, vmem_limit // 8)
    return vmem_limit, tile_budget


def _sublane_multiple(itemsize):
    # f32 -> 8, bf16 -> 16, int8/fp8 -> 32 (sub-32-bit dtypes pack along sublanes).
    return max(8, 8 * (4 // max(1, min(4, itemsize))))


def _pick_row_tile(B, d_lanes, sublane_mult, tile_budget_bytes):
    """Rows per tile, budgeted in f32 compute bytes, rounded to sublane_mult."""
    rows = tile_budget_bytes // max(1, d_lanes * 4)
    rows = (rows // sublane_mult) * sublane_mult
    rows = max(sublane_mult, rows)
    if B <= rows:
        return B  # full-extent block along rows (always legal); grid = 1
    return rows


def _pick_d_tile(d128, tile_budget_bytes, sublane_mult):
    """Lane tile (multiple of 128) that divides d128, for the wide-D path."""
    nblk = d128 // _LANE
    max_blk = max(1, min(nblk, 16, tile_budget_bytes // (sublane_mult * 4 * _LANE)))
    for cand in range(max_blk, 0, -1):
        if nblk % cand == 0:
            return cand * _LANE
    return _LANE


# --------------------------------------------------------------------------
# Fused single-call kernel: full D on the lane axis, rows tiled on sublanes.
# --------------------------------------------------------------------------
def _layernorm_fused_kernel(x_ref, w_ref, b_ref, o_ref, *, eps, d, d_pad):
    # x_ref: (TB, D_pad); w_ref/b_ref: (1, D_pad) resident across all steps.
    x = x_ref[...].astype(jnp.float32)
    inv_d = jnp.float32(1.0 / d)

    # Padded lanes of x are zero, so sum(x) / d is the exact mean.
    mean = jnp.sum(x, axis=-1, keepdims=True) * inv_d

    # Two-pass variance on the VMEM-resident tile: robust to |mean| >> std,
    # no extra HBM traffic.
    diff = x - mean
    if d_pad != d:
        lane = jax.lax.broadcasted_iota(jnp.int32, x.shape, dimension=x.ndim - 1)
        diff = jnp.where(lane < d, diff, 0.0)
    var = jnp.sum(diff * diff, axis=-1, keepdims=True) * inv_d
    inv = jax.lax.rsqrt(var + jnp.float32(eps))

    w = w_ref[...].astype(jnp.float32)
    b = b_ref[...].astype(jnp.float32)
    o_ref[...] = (diff * inv * w + b).astype(o_ref.dtype)


# --------------------------------------------------------------------------
# Wide-D path: (1) stats kernel with a running reduction over D blocks,
# (2) fully parallel normalize kernel.
# --------------------------------------------------------------------------
def _stats_kernel(x_ref, mean_ref, inv_ref, s_acc, sq_acc, *, eps, d):
    j = pl.program_id(1)

    @pl.when(j == 0)
    def _():
        s_acc[...] = jnp.zeros_like(s_acc)
        sq_acc[...] = jnp.zeros_like(sq_acc)

    x = x_ref[...].astype(jnp.float32)
    s_acc[...] += jnp.sum(x, axis=-1, keepdims=True)
    sq_acc[...] += jnp.sum(x * x, axis=-1, keepdims=True)

    @pl.when(j == pl.num_programs(1) - 1)
    def _():
        inv_d = jnp.float32(1.0 / d)
        mean = s_acc[...] * inv_d
        # Single-pass E[x^2]-mean^2 here (x is not VMEM-resident across the
        # D tiling); clamp guards cancellation. Padded lanes are zero -> exact.
        var = jnp.maximum(sq_acc[...] * inv_d - mean * mean, 0.0)
        mean_ref[...] = mean
        inv_ref[...] = jax.lax.rsqrt(var + jnp.float32(eps))


def _normalize_kernel(x_ref, mean_ref, inv_ref, w_ref, b_ref, o_ref):
    x = x_ref[...].astype(jnp.float32)
    w = w_ref[...].astype(jnp.float32)
    b = b_ref[...].astype(jnp.float32)
    o_ref[...] = ((x - mean_ref[...]) * inv_ref[...] * w + b).astype(o_ref.dtype)


# --------------------------------------------------------------------------
# Wrapper
# --------------------------------------------------------------------------
def layer_norm_pallas(x, weight, bias, eps=1e-5, *, force_d_tiled=False):
    """Functional LayerNorm matching torch.nn.functional.layer_norm semantics."""
    norm_ndim = weight.ndim
    norm_shape = x.shape[x.ndim - norm_ndim:]
    assert norm_shape == tuple(weight.shape) == tuple(bias.shape)
    D = math.prod(norm_shape)
    lead_shape = x.shape[: x.ndim - norm_ndim]
    B = math.prod(lead_shape) if lead_shape else 1

    itemsize = jnp.dtype(x.dtype).itemsize
    sublane_mult = _sublane_multiple(itemsize)
    vmem_limit, tile_budget = _budgets()

    x2 = x.reshape(B, D)
    w2 = weight.reshape(1, D)
    b2 = bias.reshape(1, D)

    # Lane-dense layout: pad D to a multiple of 128 so the output stores are
    # unmasked full-lane vst (padded lanes masked out of the variance and
    # sliced off the result).
    d128 = _round_up(D, _LANE)

    use_fused = (not force_d_tiled) and (sublane_mult * d128 * 4 <= tile_budget)

    if use_fused:
        if d128 != D:
            x2 = jnp.pad(x2, ((0, 0), (0, d128 - D)))
            w2 = jnp.pad(w2, ((0, 0), (0, d128 - D)), constant_values=1)
            b2 = jnp.pad(b2, ((0, 0), (0, d128 - D)))
        TB = _pick_row_tile(B, d128, sublane_mult, tile_budget)
        grid = (pl.cdiv(B, TB),)

        out2 = pl.pallas_call(
            functools.partial(_layernorm_fused_kernel, eps=eps, d=D, d_pad=d128),
            out_shape=jax.ShapeDtypeStruct((B, d128), x.dtype),
            grid_spec=pltpu.PrefetchScalarGridSpec(
                num_scalar_prefetch=0,
                grid=grid,
                in_specs=[
                    pl.BlockSpec((TB, d128), lambda i: (i, 0)),
                    pl.BlockSpec((1, d128), lambda i: (0, 0)),
                    pl.BlockSpec((1, d128), lambda i: (0, 0)),
                ],
                out_specs=pl.BlockSpec((TB, d128), lambda i: (i, 0)),
            ),
            compiler_params=pltpu.CompilerParams(
                dimension_semantics=("parallel",),  # shards across v7x's 2 TCs
                vmem_limit_bytes=vmem_limit,
            ),
            cost_estimate=pl.CostEstimate(
                flops=int(8 * B * D),
                transcendentals=int(B),
                bytes_accessed=int(
                    2 * B * d128 * itemsize + 2 * d128 * jnp.dtype(weight.dtype).itemsize
                ),
            ),
        )(x2, w2, b2)

        if d128 != D:
            out2 = out2[:, :D]
        return out2.reshape(x.shape)

    # ---------------- Wide-D path (D tiled over a reduction grid axis) -------
    TD = _pick_d_tile(d128, tile_budget, sublane_mult)
    D_wide = d128  # TD divides d128 by construction
    if D_wide != D:
        x2 = jnp.pad(x2, ((0, 0), (0, D_wide - D)))
        w2 = jnp.pad(w2, ((0, 0), (0, D_wide - D)), constant_values=1)
        b2 = jnp.pad(b2, ((0, 0), (0, D_wide - D)))
    TB = _pick_row_tile(B, TD, sublane_mult, tile_budget)
    grid = (pl.cdiv(B, TB), D_wide // TD)

    mean, inv = pl.pallas_call(
        functools.partial(_stats_kernel, eps=eps, d=D),
        out_shape=(
            jax.ShapeDtypeStruct((B, 1), jnp.float32),
            jax.ShapeDtypeStruct((B, 1), jnp.float32),
        ),
        grid_spec=pltpu.PrefetchScalarGridSpec(
            num_scalar_prefetch=0,
            grid=grid,
            in_specs=[pl.BlockSpec((TB, TD), lambda i, j: (i, j))],
            out_specs=(
                pl.BlockSpec((TB, 1), lambda i, j: (i, 0)),
                pl.BlockSpec((TB, 1), lambda i, j: (i, 0)),
            ),
            scratch_shapes=[
                pltpu.VMEM((TB, 1), jnp.float32),
                pltpu.VMEM((TB, 1), jnp.float32),
            ],
        ),
        compiler_params=pltpu.CompilerParams(
            dimension_semantics=("parallel", "arbitrary"),
            vmem_limit_bytes=vmem_limit,
        ),
        cost_estimate=pl.CostEstimate(
            flops=int(3 * B * D),
            transcendentals=int(B),
            bytes_accessed=int(B * D_wide * itemsize + 2 * B * 4),
        ),
    )(x2)

    out2 = pl.pallas_call(
        _normalize_kernel,
        out_shape=jax.ShapeDtypeStruct((B, D_wide), x.dtype),
        grid_spec=pltpu.PrefetchScalarGridSpec(
            num_scalar_prefetch=0,
            grid=grid,
            in_specs=[
                pl.BlockSpec((TB, TD), lambda i, j: (i, j)),
                pl.BlockSpec((TB, 1), lambda i, j: (i, 0)),
                pl.BlockSpec((TB, 1), lambda i, j: (i, 0)),
                pl.BlockSpec((1, TD), lambda i, j: (0, j)),
                pl.BlockSpec((1, TD), lambda i, j: (0, j)),
            ],
            out_specs=pl.BlockSpec((TB, TD), lambda i, j: (i, j)),
        ),
        compiler_params=pltpu.CompilerParams(
            dimension_semantics=("parallel", "parallel"),
            vmem_limit_bytes=vmem_limit,
        ),
        cost_estimate=pl.CostEstimate(
            flops=int(4 * B * D),
            transcendentals=0,
            bytes_accessed=int(2 * B * D_wide * itemsize + 2 * B * 4),
        ),
    )(x2, mean, inv, w2, b2)

    if D_wide != D:
        out2 = out2[:, :D]
    return out2.reshape(x.shape)


def layer_norm(x, weight, bias, eps=1e-5, min_pallas_elems=1 << 16):
    """Dispatcher: plain-jnp for tiny inputs (kernel dispatch would dominate),
    Pallas kernel otherwise."""
    if x.size < min_pallas_elems:
        axes = tuple(range(x.ndim - weight.ndim, x.ndim))
        mean = jnp.mean(x, axis=axes, keepdims=True)
        var = jnp.mean(jnp.square(x - mean), axis=axes, keepdims=True)
        return ((x - mean) * jax.lax.rsqrt(var + eps) * weight + bias).astype(x.dtype)
    return layer_norm_pallas(x, weight, bias, eps=eps)


if __name__ == "__main__":
    eps = 1e-5
    key = jax.random.PRNGKey(0)
    k0, k1, k2, k3 = jax.random.split(key, 4)

    def ref_layer_norm(x, w, b, eps):
        xf = x.astype(jnp.float32)
        axes = tuple(range(x.ndim - w.ndim, x.ndim))
        mean = jnp.mean(xf, axis=axes, keepdims=True)
        var = jnp.mean(jnp.square(xf - mean), axis=axes, keepdims=True)
        return ((xf - mean) * jax.lax.rsqrt(var + eps) * w + b).astype(x.dtype)

    # --- 1) Module config: normalized_shape = (4, 16, 16), batch = 2 ---------
    normalized_shape = (4, 16, 16)
    batch = 2
    weight = jnp.ones(normalized_shape, dtype=jnp.float32)   # as in Model.__init__
    bias = jnp.zeros(normalized_shape, dtype=jnp.float32)
    x = jax.random.normal(k0, (batch,) + normalized_shape, dtype=jnp.float32)

    out = jax.block_until_ready(layer_norm_pallas(x, weight, bias, eps=eps))
    assert out.shape == x.shape and out.dtype == x.dtype
    err = float(jnp.max(jnp.abs(out - ref_layer_norm(x, weight, bias, eps))))
    assert err < 1e-4, f"fused path max error {err}"

    # --- 2) Fused path, D not a multiple of 128 (padding + lane mask) --------
    ns2 = (5, 24)  # D = 120 -> padded to 128 lanes
    w2 = jax.random.normal(k1, ns2, dtype=jnp.float32) * 0.1 + 1.0
    b2 = jax.random.normal(k2, ns2, dtype=jnp.float32) * 0.1
    x2 = jax.random.normal(k3, (3, 7) + ns2, dtype=jnp.float32) * 2.0 + 0.5
    out2 = jax.block_until_ready(layer_norm_pallas(x2, w2, b2, eps=eps))
    err2 = float(jnp.max(jnp.abs(out2 - ref_layer_norm(x2, w2, b2, eps))))
    assert err2 < 1e-4, f"padded fused path max error {err2}"

    # --- 3) Forced wide-D (D-tiled two-kernel) path at small size ------------
    out3 = jax.block_until_ready(
        layer_norm_pallas(x2, w2, b2, eps=eps, force_d_tiled=True)
    )
    err3 = float(jnp.max(jnp.abs(out3 - ref_layer_norm(x2, w2, b2, eps))))
    assert err3 < 1e-4, f"D-tiled path max error {err3}"

    print("KERNEL_OK")
</pallas_src>

<mosaic_0001>
module attributes {stable_mosaic.version = 11 : i64} {
  func.func @_layernorm_fused_kernel(%arg0: i32, %arg1: memref<2x1024xf32, #tpu.memory_space<vmem>>, %arg2: memref<1x1024xf32, #tpu.memory_space<vmem>>, %arg3: memref<1x1024xf32, #tpu.memory_space<vmem>>, %arg4: memref<2x1024xf32, #tpu.memory_space<vmem>>) attributes {dimension_semantics = [#tpu.dimension_semantics<parallel>], iteration_bounds = array<i64: 1>, scalar_prefetch = 0 : i64, scratch_operands = 0 : i64, tpu.core_type = #tpu.core_type<tc>, window_params = [{transform_indices = @transform_0, window_bounds = array<i64: 2, 1024>}, {pipeline_mode = #tpu.pipeline_mode<synchronous>, transform_indices = @transform_1, window_bounds = array<i64: 1, 1024>}, {pipeline_mode = #tpu.pipeline_mode<synchronous>, transform_indices = @transform_2, window_bounds = array<i64: 1, 1024>}, {transform_indices = @transform_3, window_bounds = array<i64: 2, 1024>}]} {
    %c0 = arith.constant 0 : index
    %c0_0 = arith.constant 0 : index
    %0 = vector.load %arg1[%c0, %c0_0] : memref<2x1024xf32, #tpu.memory_space<vmem>>, vector<2x1024xf32>
    %cst = arith.constant dense<0.000000e+00> : vector<2xf32>
    %1 = vector.multi_reduction <add>, %0, %cst [1] : vector<2x1024xf32> to vector<2xf32>
    %2 = vector.shape_cast %1 : vector<2xf32> to vector<2x1xf32>
    %cst_1 = arith.constant 9.765625E-4 : f32
    %3 = vector.broadcast %cst_1 : f32 to vector<2x1xf32>
    %4 = arith.mulf %2, %3 : vector<2x1xf32>
    %5 = vector.broadcast %4 : vector<2x1xf32> to vector<2x1024xf32>
    %6 = arith.subf %0, %5 : vector<2x1024xf32>
    %7 = arith.mulf %6, %6 : vector<2x1024xf32>
    %cst_2 = arith.constant dense<0.000000e+00> : vector<2xf32>
    %8 = vector.multi_reduction <add>, %7, %cst_2 [1] : vector<2x1024xf32> to vector<2xf32>
    %9 = vector.shape_cast %8 : vector<2xf32> to vector<2x1xf32>
    %cst_3 = arith.constant 9.765625E-4 : f32
    %10 = vector.broadcast %cst_3 : f32 to vector<2x1xf32>
    %11 = arith.mulf %9, %10 : vector<2x1xf32>
    %cst_4 = arith.constant 9.99999974E-6 : f32
    %12 = vector.broadcast %cst_4 : f32 to vector<2x1xf32>
    %13 = arith.addf %11, %12 : vector<2x1xf32>
    %14 = math.rsqrt %13 : vector<2x1xf32>
    %c0_5 = arith.constant 0 : index
    %c0_6 = arith.constant 0 : index
    %15 = vector.load %arg2[%c0_5, %c0_6] : memref<1x1024xf32, #tpu.memory_space<vmem>>, vector<1x1024xf32>
    %c0_7 = arith.constant 0 : index
    %c0_8 = arith.constant 0 : index
    %16 = vector.load %arg3[%c0_7, %c0_8] : memref<1x1024xf32, #tpu.memory_space<vmem>>, vector<1x1024xf32>
    %17 = vector.broadcast %14 : vector<2x1xf32> to vector<2x1024xf32>
    %18 = arith.mulf %6, %17 : vector<2x1024xf32>
    %19 = vector.broadcast %15 : vector<1x1024xf32> to vector<2x1024xf32>
    %20 = arith.mulf %18, %19 : vector<2x1024xf32>
    %21 = vector.broadcast %16 : vector<1x1024xf32> to vector<2x1024xf32>
    %22 = arith.addf %20, %21 : vector<2x1024xf32>
    %c0_9 = arith.constant 0 : index
    %c0_10 = arith.constant 0 : index
    %23 = vector.load %arg4[%c0_9, %c0_10] : memref<2x1024xf32, #tpu.memory_space<vmem>>, vector<2x1024xf32>
    tpu.vector_store %arg4[%c0_9, %c0_10], %22 {strides = array<i32>} : memref<2x1024xf32, #tpu.memory_space<vmem>>, vector<2x1024xf32>,
    return
  }
  func.func @transform_0(%arg0: i32) -> (i32, i32) {
    %c0_i32 = arith.constant 0 : i32
    %c0_i32_0 = arith.constant 0 : i32
    return %arg0, %c0_i32 : i32, i32
  }
  func.func @transform_1(%arg0: i32) -> (i32, i32) {
    %c0_i32 = arith.constant 0 : i32
    %c0_i32_0 = arith.constant 0 : i32
    %c0_i32_1 = arith.constant 0 : i32
    return %c0_i32, %c0_i32_0 : i32, i32
  }
  func.func @transform_2(%arg0: i32) -> (i32, i32) {
    %c0_i32 = arith.constant 0 : i32
    %c0_i32_0 = arith.constant 0 : i32
    %c0_i32_1 = arith.constant 0 : i32
    return %c0_i32, %c0_i32_0 : i32, i32
  }
  func.func @transform_3(%arg0: i32) -> (i32, i32) {
    %c0_i32 = arith.constant 0 : i32
    %c0_i32_0 = arith.constant 0 : i32
    return %arg0, %c0_i32 : i32, i32
  }
}

</mosaic_0001>

<bundles_post_ra>
// kernel: tpu_custom_call.1
= control target key start
LH: loop header
LB: loop body
LE: loop exit
PB: predicated region body
PF: predicated region fallthrough
CT: control target
= control target key end

     0   :  { %8 = vsyncpa [#allocation3], 0  ;;  %s603_s0 = inlined_call_operand.hbm [shape: f32[2,1024], index: 0, kind: input, shape index: {}]   ;;  %s604_s1 = inlined_call_operand.hbm [shape: f32[1,1024], index: 1, kind: input, shape index: {}]   ;;  %s605_s2 = inlined_call_operand.hbm [shape: f32[1,1024], index: 2, kind: input, shape index: {}]   ;;  %s606_s3 = inlined_call_operand.hbm [shape: f32[2,1024], index: 3, kind: output, shape index: {}]  }
   0x1   :  { %9 = vsyncpa [#allocation6], 0 }
   0x2   :  { %10 = vsyncpa [#allocation4], 0  ;;  %s469_s12 = smov [#allocation5]   ;;  %s470_s14 = smov [#allocation2]  }
   0x3   :  { %s27_s13 = sshll.u32 %s469_s12, 4  ;;  %s17_s15 = sshll.u32 %s470_s14, 4  ;;  %s28_s13 = int_to_ptr.vmem [resolvable:$true] %s27_s13  ;;  %s18_s15 = int_to_ptr.vmem [resolvable:$true] %s17_s15 }
   0x4   :  { %s375_s18 = scalar_lea.hbm %s604_s1, 128 }
   0x5   :  { %p376_p0 = scmp.ne.s32.totalorder %s604_s1, %s375_s18  ;;  %p379_p1 = scmp.lt.u32.totalorder %s375_s18, %s604_s1 }
   0x7   :  { %p381_p2 = pnand %p379_p1, %p376_p0 }
   0x9   :  { %384 = shalt.err (!%p381_p2)
}
   0xa   :  { %s385_s23 = scalar_lea.vmem %s28_s13, 128  ;;  %p390_p4 = scmp.lt.s32.totalorder %s28_s13, %s28_s13 }
   0xb   :  { %p386_p3 = scmp.ne.s32.totalorder %s28_s13, %s385_s23  ;;  %p391_p5 = scmp.lt.s32.totalorder %s385_s23, %s385_s23 }
   0xd   :  { %p392_p6 = por %p391_p5, %p390_p4 }
   0xf   :  { %p393_p7 = pnand %p392_p6, %p386_p3 }
  0x11   :  { %396 = shalt.err (!%p393_p7)
}
  0x12   :  { %30 = dma.hbm_to_vmem [thread:$0]  %s604_s1, 128, %s28_s13, [#allocation6]  }
  0x13   :  { %s397_s28 = scalar_lea.hbm %s603_s0, 256 }
  0x14   :  { %p398_p8 = scmp.ne.s32.totalorder %s603_s0, %s397_s28  ;;  %p401_p9 = scmp.lt.u32.totalorder %s397_s28, %s603_s0 }
  0x16   :  { %p403_p10 = pnand %p401_p9, %p398_p8 }
  0x18   :  { %406 = shalt.err (!%p403_p10)
}
  0x19   :  { %s407_s6 = scalar_lea.vmem %s18_s15, 256  ;;  %p412_p12 = scmp.lt.s32.totalorder %s18_s15, %s18_s15 }
  0x1a   :  { %p408_p11 = scmp.ne.s32.totalorder %s18_s15, %s407_s6  ;;  %p413_p13 = scmp.lt.s32.totalorder %s407_s6, %s407_s6 }
  0x1c   :  { %p414_p0 = por %p413_p13, %p412_p12 }
  0x1e   :  { %p415_p1 = pnand %p414_p0, %p408_p11 }
  0x20   :  { %418 = shalt.err (!%p415_p1)
}
  0x21   :  { %20 = dma.hbm_to_vmem [thread:$0]  %s603_s0, 256, %s18_s15, [#allocation3]  }
  0x22   :  { %s471_s8 = smov [#allocation7]   ;;  %s419_s12 = scalar_lea.hbm %s605_s2, 128 }
  0x23   :  { %s37_s9 = sshll.u32 %s471_s8, 4  ;;  %p420_p2 = scmp.ne.s32.totalorder %s605_s2, %s419_s12  ;;  %s38_s9 = int_to_ptr.vmem [resolvable:$true] %s37_s9 }
  0x24   :  { %p423_p3 = scmp.lt.u32.totalorder %s419_s12, %s605_s2 }
  0x26   :  { %p425_p4 = pnand %p423_p3, %p420_p2 }
  0x28   :  { %428 = shalt.err (!%p425_p4)
}
  0x29   :  { %s429_s18 = scalar_lea.vmem %s38_s9, 128  ;;  %p434_p6 = scmp.lt.s32.totalorder %s38_s9, %s38_s9 }
  0x2a   :  { %p430_p5 = scmp.ne.s32.totalorder %s38_s9, %s429_s18  ;;  %p435_p7 = scmp.lt.s32.totalorder %s429_s18, %s429_s18 }
  0x2c   :  { %p436_p8 = por %p435_p7, %p434_p6 }
  0x2e   :  { %p437_p9 = pnand %p436_p8, %p430_p5 }
  0x30   :  { %440 = shalt.err (!%p437_p9)
}
  0x31   :  { %40 = dma.hbm_to_vmem [thread:$0]  %s605_s2, 128, %s38_s9, [#allocation6]  }
  0x32   :  { %463 = dma.done.wait [#allocation3], 256  }
  0x33   :  { %464 = vsyncadd [#allocation3], 4294967040 }
  0x34   :  { %465 = dma.done.wait [#allocation6], 256  }
  0x35   :  { %466 = vsyncadd [#allocation6], 4294967040  ;;  %v58_v0 = vlaneseq  ;;  %v472_v1 = vmov 1983009808   ;;  %v50_v6 = vld [vmem:[#allocation2] sm:$0xff]  ;;  %v51_v7 = vld [vmem:[#allocation2 + $0x8] sm:$0xff] }
  0x36   :  { %v56_v2 = vunpack.c.l.s4 %v472_v1  ;;  %v54_v8 = vcombine.high %v50_v6, %v50_v6  ;;  %vm96_vm0 = vcmask 1041408   ;;  %v71_v12 = vcombine.high %v51_v7, %v51_v7  ;;  %s474_s2 = smov [#allocation8]  }
  0x37   :  { %v531_v3 = vshrl.u32 %v58_v0, 7  ;;  %v473_v33 = vmov 269488144   ;;  %s355_s19 = sshll.u32 %s474_s2, 4  ;;  %s356_s19 = int_to_ptr.vmem [resolvable:$true] %s355_s19 }
  0x38   :  { %v57_v4 = vunpack.c.0.s8 %v56_v2  ;;  %v117_v34 = vunpack.c.l.s4 %v473_v33  ;;  %s441_s20 = scalar_lea.vmem %s356_s19, 256  ;;  %p446_p11 = scmp.lt.s32.totalorder %s356_s19, %s356_s19 }
  0x39   :  { %p442_p10 = scmp.ne.s32.totalorder %s356_s19, %s441_s20  ;;  %p447_p12 = scmp.lt.s32.totalorder %s441_s20, %s441_s20 }
  0x3a   :  { %v534_v5 = vsub.s32 %v57_v4, %v531_v3  ;;  %v118_v35 = vunpack.c.0.s8 %v117_v34 }
  0x3b   :  { %p448_p13 = por %p447_p12, %p446_p11 }
  0x3c   :  { %v61_v9 = vrot.slane %v50_v6, %v534_v5  ;;  %v68_v10 = vrot.slane %v54_v8, %v534_v5  ;;  %v78_v13 = vrot.slane %v51_v7, %v534_v5  ;;  %v85_v19 = vrot.slane %v71_v12, %v534_v5 }
  0x3d   :  { %v549_v36 = vsub.s32 %v118_v35, %v531_v3  ;;  %v212_v8 = vsub.s32 1, %v531_v3  ;;  %v224_v12 = vsub.s32 4, %v531_v3  ;;  %p449_p0 = pnand %p448_p13, %p442_p10 }
  0x3e   :  { %v69_v11 = vcombine.high %v61_v9, %v61_v9  ;;  %v97_v14 = vsel %vm96_vm0, %v61_v9, 0.0  ;;  %v70_v15 = vcombine.high %v68_v10, %v68_v10  ;;  %v100_v17 = vsel %vm96_vm0, %v68_v10, 0.0  ;;  %v192_v9 = vld [vmem:[#allocation5] sm:$0xff] }
  0x3f   :  { %v86_v20 = vcombine.high %v78_v13, %v78_v13  ;;  %v104_v23 = vsel %vm96_vm0, %v78_v13, 0.0  ;;  %v87_v25 = vcombine.high %v85_v19, %v85_v19  ;;  %v108_v28 = vsel %vm96_vm0, %v85_v19, 0.0 }
  0x40   :  { %v98_v16 = vsel %vm96_vm0, %v69_v11, 0.0  ;;  %v102_v21 = vsel %vm96_vm0, %v70_v15, 0.0  ;;  %v216_v10 = vsub.s32 2, %v531_v3  ;;  %v220_v11 = vsub.s32 3, %v531_v3 }
  0x41   :  { %v99_v18 = vadd.f32 %v98_v16, %v97_v14  ;;  %v106_v26 = vsel %vm96_vm0, %v86_v20, 0.0  ;;  %v110_v30 = vsel %vm96_vm0, %v87_v25, 0.0  ;;  %v228_v14 = vsub.s32 5, %v531_v3 }
  0x42   :  { %v232_v15 = vsub.s32 6, %v531_v3  ;;  %v236_v16 = vsub.s32 7, %v531_v3  ;;  %v213_v20 = vrot.slane %v192_v9, %v212_v8 }
  0x43   :  { %v101_v22 = vadd.f32 %v100_v17, %v99_v18  ;;  %v193_v18 = vld [vmem:[#allocation7] sm:$0xff]  ;;  %v229_v25 = vrot.slane %v192_v9, %v228_v14 }
  0x44   :  { %v300_v33 = vrot.slane %v193_v18, %v228_v14  ;;  %v304_v34 = vrot.slane %v193_v18, %v232_v15 }
  0x45   :  { %v103_v24 = vadd.f32 %v102_v21, %v101_v22  ;;  %v217_v22 = vrot.slane %v192_v9, %v216_v10 }
  0x47   :  { %v105_v27 = vadd.f32 %v104_v23, %v103_v24  ;;  %v221_v23 = vrot.slane %v192_v9, %v220_v11  ;;  %v225_v24 = vrot.slane %v192_v9, %v224_v12 }
  0x49   :  { %v107_v29 = vadd.f32 %v106_v26, %v105_v27  ;;  %v233_v26 = vrot.slane %v192_v9, %v232_v15  ;;  %v237_v27 = vrot.slane %v192_v9, %v236_v16 }
  0x4b   :  { %v109_v31 = vadd.f32 %v108_v28, %v107_v29  ;;  %v284_v29 = vrot.slane %v193_v18, %v212_v8 }
  0x4d   :  { %v111_v32 = vadd.f32 %v110_v30, %v109_v31  ;;  %v288_v30 = vrot.slane %v193_v18, %v216_v10  ;;  %v292_v31 = vrot.slane %v193_v18, %v220_v11 }
  0x4f   :  { %112 = vadd.xlane.f32.xlu0 %v111_v32  ;;  %v296_v32 = vrot.slane %v193_v18, %v224_v12 }
  0xdc   :  { %v113_v37 = vpop.xlane.xlu0 %112 }
  0xdd   :  { %v114_v38 = vmul.f32 0.0009765625, %v113_v37  ;;  %v239_v37 = vcombine.low %v217_v22, %v221_v23 }
  0xdf   :  { %v122_v39 = vrot.slane %v114_v38, %v549_v36  ;;  %v255_v38 = vcombine.low %v225_v24, %v229_v25 }
  0xe1   :  { %v552_v40 = vsub.f32 %v50_v6, %v122_v39  ;;  %v554_v41 = vsub.f32 %v51_v7, %v122_v39  ;;  %v208_v7 = vsub.s32 0, %v531_v3  ;;  %v308_v3 = vrot.slane %v193_v18, %v236_v16 }
  0xe2   :  { %v256_v39 = vcombine.low %v233_v26, %v237_v27 }
  0xe3   :  { %v126_v42 = vmul.f32 %v552_v40, %v552_v40  ;;  %v127_v43 = vmul.f32 %v554_v41, %v554_v41  ;;  %v209_v19 = vrot.slane %v192_v9, %v208_v7  ;;  %v280_v28 = vrot.slane %v193_v18, %v208_v7 }
  0xe5   :  { %v130_v44 = vcombine.high %v126_v42, %v126_v42  ;;  %v137_v45 = vrot.slane %v126_v42, %v534_v5  ;;  %v154_v48 = vrot.slane %v127_v43, %v534_v5  ;;  %v147_v52 = vcombine.high %v127_v43, %v127_v43 }
  0xe6   :  { %v238_v35 = vcombine.low %v209_v19, %v213_v20  ;;  %v309_v42 = vcombine.low %v280_v28, %v284_v29  ;;  %v310_v43 = vcombine.low %v288_v30, %v292_v31 }
  0xe7   :  { %v144_v46 = vrot.slane %v130_v44, %v534_v5  ;;  %v145_v47 = vcombine.high %v137_v45, %v137_v45  ;;  %v172_v49 = vsel %vm96_vm0, %v137_v45, 0.0  ;;  %v161_v56 = vrot.slane %v147_v52, %v534_v5 }
  0xe8   :  { %v162_v57 = vcombine.high %v154_v48, %v154_v48  ;;  %v179_v60 = vsel %vm96_vm0, %v154_v48, 0.0  ;;  %v326_v44 = vcombine.low %v296_v32, %v300_v33  ;;  %v327_v45 = vcombine.low %v304_v34, %v308_v3 }
  0xe9   :  { %v173_v50 = vsel %vm96_vm0, %v145_v47, 0.0  ;;  %v146_v51 = vcombine.high %v144_v46, %v144_v46  ;;  %v175_v54 = vsel %vm96_vm0, %v144_v46, 0.0  ;;  %v163_v62 = vcombine.high %v161_v56, %v161_v56 }
  0xea   :  { %v174_v53 = vadd.f32 %v173_v50, %v172_v49  ;;  %v181_v63 = vsel %vm96_vm0, %v162_v57, 0.0  ;;  %v183_v1 = vsel %vm96_vm0, %v161_v56, 0.0  ;;  %v246_v46 = vrot.slane %v238_v35, %v534_v5 }
  0xeb   :  { %v177_v58 = vsel %vm96_vm0, %v146_v51, 0.0  ;;  %v185_v4 = vsel %vm96_vm0, %v163_v62, 0.0  ;;  %v253_v47 = vrot.slane %v239_v37, %v534_v5  ;;  %v263_v48 = vrot.slane %v255_v38, %v534_v5 }
  0xec   :  { %v176_v55 = vadd.f32 %v175_v54, %v174_v53  ;;  %v270_v49 = vrot.slane %v256_v39, %v534_v5  ;;  %v317_v50 = vrot.slane %v309_v42, %v534_v5  ;;  %v324_v51 = vrot.slane %v310_v43, %v534_v5 }
  0xed   :  { %v334_v52 = vrot.slane %v326_v44, %v534_v5  ;;  %v341_v53 = vrot.slane %v327_v45, %v534_v5  ;;  %v254_v56 = vcombine.low %v246_v46, %v253_v47 }
  0xee   :  { %v178_v59 = vadd.f32 %v177_v58, %v176_v55  ;;  %v271_v57 = vcombine.low %v263_v48, %v270_v49 }
  0xf0   :  { %v180_v61 = vadd.f32 %v179_v60, %v178_v59  ;;  %v325_v60 = vcombine.low %v317_v50, %v324_v51 }
  0xf2   :  { %v182_v0 = vadd.f32 %v181_v63, %v180_v61  ;;  %v342_v61 = vcombine.low %v334_v52, %v341_v53 }
  0xf4   :  { %v184_v2 = vadd.f32 %v183_v1, %v182_v0 }
  0xf6   :  { %v186_v6 = vadd.f32 %v185_v4, %v184_v2 }
  0xf8   :  { %187 = vadd.xlane.f32.xlu0 %v186_v6 }
 0x185   :  { %v188_v13 = vpop.xlane.xlu0 %187 }
 0x186   :  { %v189_v17 = vmul.f32 0.0009765625, %v188_v13 }
 0x188   :  { %v190_v21 = vadd.f32 1e-05, %v189_v17 }
 0x18a   :  { %373 = vrsqrt.f32 %v190_v21 }
 0x194   :  { %v374_v54 = vpop.eup %373 }
 0x195   :  { %v201_v55 = vrot.slane %v374_v54, %v549_v36 }
 0x197   :  { %v203_v58 = vmul.f32 %v201_v55, %v552_v40  ;;  %v204_v59 = vmul.f32 %v201_v55, %v554_v41 }
 0x199   :  { %v274_v62 = vmul.f32 %v254_v56, %v203_v58  ;;  %v275_v63 = vmul.f32 %v271_v57, %v204_v59 }
 0x19b   :  { %v345_v0 = vadd.f32 %v325_v60, %v274_v62  ;;  %v346_v1 = vadd.f32 %v342_v61, %v275_v63 }
 0x19d   :  { %347 = vst [vmem:[#allocation8] sm:$0xff] %v345_v0  ;;  %348 = vst [vmem:[#allocation8 + $0x8] sm:$0xff] %v346_v1 }
 0x19e   :  { %452 = shalt.err (!%p449_p0)
}
 0x19f   :  { %s453_s23 = scalar_lea.hbm %s606_s3, 256 }
 0x1a0   :  { %p454_p1 = scmp.ne.s32.totalorder %s606_s3, %s453_s23  ;;  %p457_p2 = scmp.lt.u32.totalorder %s453_s23, %s606_s3 }
 0x1a2   :  { %p459_p3 = pnand %p457_p2, %p454_p1 }
 0x1a4   :  { %462 = shalt.err (!%p459_p3)
}
 0x1a5   :  { %358 = dma.vmem_to_hbm [thread:$0]  %s356_s19, 256, %s606_s3, [#allocation4]  }
 0x1a6   :  { %467 = dma.done.wait [#allocation4], 256  }
 0x1a7   :  { %468 = vsyncadd [#allocation4], 4294967040 }
 0x1a8   :  { %362 = vsyncpa [#allocation3], 1 }
 0x1a9   :  { %363 = vsyncpa [#allocation6], 1 }
 0x1aa   :  { %364 = vsyncpa [#allocation4], 1 }

</bundles_post_ra>
